<compile_context>
chip_gen: v7x
topology: tpu7x:2x2x1
jax: 0.10.0
libtpu: 0.0.40
codegen_flags: <defaults>
</compile_context>

<pallas_src>
import math
import functools

import numpy as np
import jax
import jax.numpy as jnp
from jax.experimental import pallas as pl
from jax.experimental.pallas import tpu as pltpu


_VMEM_LIMIT = 32 * 1024 * 1024  # scoped-VMEM budget; safe on v5e/v6e (128 MiB) and v7x (64 MiB)


def _pick_tile(dim, target, multiple):
    """Largest tile <= target that divides dim and is a multiple of `multiple`.
    Falls back to the full dim (always a legal block shape)."""
    if dim <= target:
        return dim
    t = (target // multiple) * multiple
    while t >= multiple:
        if dim % t == 0:
            return t
        t -= multiple
    return dim


@functools.lru_cache(maxsize=None)
def _exp_in_bf16():
    """bf16 EUP exists on v6e / v7x; keep exp in f32 on v5e/v5p/v4 and older."""
    try:
        kind = jax.devices()[0].device_kind.lower()
    except Exception:
        return False
    return ("v6" in kind) or ("v7" in kind) or ("7x" in kind)


# ---------------------------------------------------------------------------
# Kernel 1: tiled linear layer  y = x @ W + b
#   x: (M, Cin),  W pre-transposed bf16: (Cin, Cout),  b: (Cout,) f32
# ---------------------------------------------------------------------------
def _linear_kernel(x_ref, w_ref, b_ref, o_ref):
    x = x_ref[...].astype(jnp.bfloat16)                               # (tm, Cin)
    y = jnp.dot(x, w_ref[...], preferred_element_type=jnp.float32)    # bf16 MXU, f32 acc
    o_ref[...] = (y + b_ref[...]).astype(o_ref.dtype)                 # f32 bias add


def linear(x, w, b, out_dtype=None, tm_target=512, tn_target=256):
    """x: (M, Cin), w: (Cin, Cout) bf16 pre-transposed, b: (Cout,) -> (M, Cout)."""
    M, Cin = x.shape
    Cout = w.shape[1]
    if out_dtype is None:
        out_dtype = x.dtype
    tm = _pick_tile(M, tm_target, 8)        # sublane-aligned row tile
    tn = _pick_tile(Cout, tn_target, 128)   # lane-aligned (MXU-native) col tile
    grid = (M // tm, Cout // tn)
    b2 = b.reshape(1, Cout).astype(jnp.float32)

    bytes_accessed = (x.size * x.dtype.itemsize + w.size * w.dtype.itemsize
                      + b2.size * 4 + M * Cout * np.dtype(out_dtype).itemsize)
    cost = pl.CostEstimate(flops=2 * M * Cin * Cout, transcendentals=0,
                           bytes_accessed=int(bytes_accessed))

    return pl.pallas_call(
        _linear_kernel,
        out_shape=jax.ShapeDtypeStruct((M, Cout), out_dtype),
        grid_spec=pltpu.PrefetchScalarGridSpec(
            num_scalar_prefetch=0,
            grid=grid,
            in_specs=[
                pl.BlockSpec((tm, Cin), lambda i, j: (i, 0)),
                pl.BlockSpec((Cin, tn), lambda i, j: (0, j)),
                pl.BlockSpec((1, tn), lambda i, j: (0, j)),
            ],
            out_specs=pl.BlockSpec((tm, tn), lambda i, j: (i, j)),
        ),
        compiler_params=pltpu.CompilerParams(
            dimension_semantics=("parallel", "parallel"),
            vmem_limit_bytes=_VMEM_LIMIT,
        ),
        cost_estimate=cost,
    )(x, w, b2)


# ---------------------------------------------------------------------------
# Kernel 2: flash-style multi-head attention core, interleaved-head layout
#   q block: (1, tq, ID),  k/v blocks: (1, tk, ID),  ID = H*d
#   grid = (B, Nq-tiles, Nk-tiles);  Nk is the last ("arbitrary") reduction axis.
# ---------------------------------------------------------------------------
def _flash_attn_kernel(q_ref, k_ref, v_ref, o_ref, m_sc, l_sc, acc_sc,
                       *, num_heads, transpose_k_once, exp_bf16):
    ki = pl.program_id(2)

    @pl.when(ki == 0)
    def _():
        m_sc[...] = jnp.full_like(m_sc, -jnp.inf)
        l_sc[...] = jnp.zeros_like(l_sc)
        acc_sc[...] = jnp.zeros_like(acc_sc)

    internal_dim = q_ref.shape[-1]
    d = internal_dim // num_heads
    tq = q_ref.shape[1]

    q = q_ref[0]                     # (tq, ID) bf16; 1/sqrt(d) already folded into weights
    k = k_ref[0]                     # (tk, ID) bf16
    v = v_ref[0]                     # (tk, ID) bf16
    if transpose_k_once:
        k_t = k.T                    # one XLU transpose per grid step, shared by all heads

    m_prev = m_sc[...]               # (tq, H) f32, lane-dense running stats
    l_prev = l_sc[...]

    m_cols, l_cols, alpha_cols, pv_cols = [], [], [], []
    # TODO(synk): static head unroll kept (needed for the register-level concat of the
    # full-width accumulator update); re-check spill% / ld-st slot_util at prod shapes.
    for h in range(num_heads):
        lo, hi = h * d, (h + 1) * d
        q_h = q[:, lo:hi]                                             # (tq, d)
        if transpose_k_once:
            s = jnp.dot(q_h, k_t[lo:hi, :],                           # sublane-aligned slice
                        preferred_element_type=jnp.float32)           # (tq, tk)
        else:
            s = jax.lax.dot_general(
                q_h, k[:, lo:hi],
                dimension_numbers=(((1,), (1,)), ((), ())),
                preferred_element_type=jnp.float32)                   # (tq, tk)

        m_p = m_prev[:, h:h + 1]                                      # (tq, 1)
        m_n = jnp.maximum(m_p, jnp.max(s, axis=-1, keepdims=True))
        alpha = jnp.exp(m_p - m_n)                                    # (tq, 1) f32
        x = s - m_n
        if exp_bf16:
            p = jnp.exp(x.astype(jnp.bfloat16))                       # bf16 EUP (v6e/v7x)
            p_sum = jnp.sum(p.astype(jnp.float32), axis=-1, keepdims=True)
            p_mm = p
        else:
            p = jnp.exp(x)                                            # f32 EUP (v5e & older)
            p_sum = jnp.sum(p, axis=-1, keepdims=True)
            p_mm = p.astype(jnp.bfloat16)
        pv = jnp.dot(p_mm, v[:, lo:hi], preferred_element_type=jnp.float32)   # (tq, d)

        m_cols.append(m_n)
        l_cols.append(alpha * l_prev[:, h:h + 1] + p_sum)
        alpha_cols.append(jnp.broadcast_to(alpha, (tq, d)))
        pv_cols.append(pv)

    # One lane-dense store of the running stats ...
    m_sc[...] = jnp.concatenate(m_cols, axis=-1)                      # (tq, H)
    l_sc[...] = jnp.concatenate(l_cols, axis=-1)                      # (tq, H)
    # ... and a single full-width, unmasked FMA into the resident accumulator
    alpha_full = jnp.concatenate(alpha_cols, axis=-1)                 # (tq, ID)
    pv_full = jnp.concatenate(pv_cols, axis=-1)                       # (tq, ID)
    acc_sc[...] = alpha_full * acc_sc[...] + pv_full

    @pl.when(ki == pl.num_programs(2) - 1)
    def _():
        inv = pl.reciprocal(l_sc[...], approx=True)                   # (tq, H), EUP slot
        inv_full = jnp.concatenate(
            [jnp.broadcast_to(inv[:, h:h + 1], (tq, d)) for h in range(num_heads)],
            axis=-1)                                                  # (tq, ID)
        # single lane-dense store of the whole (tq, ID) output tile
        o_ref[0] = (acc_sc[...] * inv_full).astype(o_ref.dtype)


def attention_core(q_arr, k_arr, v_arr, internal_dim, num_heads,
                   q_blk=0, k_blk=0, v_blk=0, tq_target=256, tk_target=1024):
    """q_arr: (B, Nq, m*ID), k_arr/v_arr: (B, Nk, m*ID) -> (B, Nq, ID).
    q_blk/k_blk/v_blk select the lane block of width ID (zero-copy fused QKV/KV)."""
    B, Nq = q_arr.shape[0], q_arr.shape[1]
    Nk = k_arr.shape[1]
    d = internal_dim // num_heads

    tq = _pick_tile(Nq, tq_target, 8)
    tk = _pick_tile(Nk, tk_target, 8)
    # v7x has 2 TensorCores: make sure the parallel grid axes expose >= 2 steps.
    while B * (Nq // tq) < 2 and tq % 16 == 0 and Nq % (tq // 2) == 0:
        tq //= 2
    grid = (B, Nq // tq, Nk // tk)

    # One k-tile transpose per grid step (instead of one XLU transpose per head per
    # step) whenever the shapes are transpose-friendly; otherwise keep the proven
    # dot_general-with-transposed-RHS path.
    transpose_k_once = (tk % 128 == 0) and (internal_dim % 128 == 0) and (d % 8 == 0)

    kernel = functools.partial(_flash_attn_kernel, num_heads=num_heads,
                               transpose_k_once=transpose_k_once,
                               exp_bf16=_exp_in_bf16())

    itemsize = q_arr.dtype.itemsize
    cost = pl.CostEstimate(
        flops=4 * B * Nq * Nk * internal_dim,                         # QK^T + PV
        transcendentals=B * num_heads * Nq * Nk,                      # exp
        bytes_accessed=int((2 * B * Nq * internal_dim
                            + 2 * B * Nk * internal_dim) * itemsize))

    return pl.pallas_call(
        kernel,
        out_shape=jax.ShapeDtypeStruct((B, Nq, internal_dim), q_arr.dtype),
        grid_spec=pltpu.PrefetchScalarGridSpec(
            num_scalar_prefetch=0,
            grid=grid,
            in_specs=[
                pl.BlockSpec((1, tq, internal_dim),
                             lambda b, qi, ki, blk=q_blk: (b, qi, blk)),
                pl.BlockSpec((1, tk, internal_dim),
                             lambda b, qi, ki, blk=k_blk: (b, ki, blk)),
                pl.BlockSpec((1, tk, internal_dim),
                             lambda b, qi, ki, blk=v_blk: (b, ki, blk)),
            ],
            # index constant across ki -> output block resident (accumulator)
            out_specs=pl.BlockSpec((1, tq, internal_dim),
                                   lambda b, qi, ki: (b, qi, 0)),
            scratch_shapes=[
                pltpu.VMEM((tq, num_heads), jnp.float32),       # running max m (lane-dense)
                pltpu.VMEM((tq, num_heads), jnp.float32),       # running sum l (lane-dense)
                pltpu.VMEM((tq, internal_dim), jnp.float32),    # accumulator (lane-dense)
            ],
        ),
        compiler_params=pltpu.CompilerParams(
            dimension_semantics=("parallel", "parallel", "arbitrary"),
            vmem_limit_bytes=_VMEM_LIMIT,
        ),
        cost_estimate=cost,
    )(q_arr, k_arr, v_arr)


# ---------------------------------------------------------------------------
# Module wrapper
# ---------------------------------------------------------------------------
class AttentionPallas:
    def __init__(self, embedding_dim, num_heads, downsample_rate=1, key=None):
        self.embedding_dim = embedding_dim
        self.internal_dim = embedding_dim // downsample_rate
        self.num_heads = num_heads
        assert self.internal_dim % num_heads == 0, "num_heads must divide embedding_dim."
        d = self.internal_dim // num_heads
        scale = 1.0 / math.sqrt(d)

        if key is None:
            key = jax.random.PRNGKey(0)
        keys = jax.random.split(key, 8)

        def init_linear(kw, kb, in_f, out_f):
            # nn.Linear-style init U(-1/sqrt(fan_in), 1/sqrt(fan_in)),
            # weight stored PRE-TRANSPOSED as (in_f, out_f) for lane-dense MXU RHS.
            bound = 1.0 / math.sqrt(in_f)
            w = jax.random.uniform(kw, (in_f, out_f), jnp.float32, -bound, bound)
            b = jax.random.uniform(kb, (out_f,), jnp.float32, -bound, bound)
            return w, b

        q_w, q_b = init_linear(keys[0], keys[1], embedding_dim, self.internal_dim)
        k_w, k_b = init_linear(keys[2], keys[3], embedding_dim, self.internal_dim)
        v_w, v_b = init_linear(keys[4], keys[5], embedding_dim, self.internal_dim)
        o_w, o_b = init_linear(keys[6], keys[7], self.internal_dim, embedding_dim)

        # f32, un-scaled copies for the pure-JAX reference.
        self._ref = dict(q_w=q_w, q_b=q_b, k_w=k_w, k_b=k_b,
                         v_w=v_w, v_b=v_b, o_w=o_w, o_b=o_b)

        # Kernel weights: bf16, with 1/sqrt(d) folded into the q projection in f32
        # (rounded to bf16 once).  Biases stay f32 (added onto the f32 accumulator).
        self.q_w = (q_w * scale).astype(jnp.bfloat16)
        self.q_b = q_b * scale
        self.k_w = k_w.astype(jnp.bfloat16)
        self.k_b = k_b
        self.v_w = v_w.astype(jnp.bfloat16)
        self.v_b = v_b
        self.o_w = o_w.astype(jnp.bfloat16)
        self.o_b = o_b

        # Fused projection weights (input read from HBM once).
        self.kv_w = jnp.concatenate([self.k_w, self.v_w], axis=1)
        self.kv_b = jnp.concatenate([self.k_b, self.v_b], axis=0)
        self.qkv_w = jnp.concatenate([self.q_w, self.k_w, self.v_w], axis=1)
        self.qkv_b = jnp.concatenate([self.q_b, self.k_b, self.v_b], axis=0)

    def __call__(self, q, k, v):
        B, Nq, C = q.shape
        Nk = k.shape[1]
        ID = self.internal_dim
        H = self.num_heads
        out_dtype = q.dtype

        # Zero-copy consumption of a fused projection by the attention kernel needs a
        # 128-lane-aligned internal_dim (BlockSpec last-dim rule); otherwise we use
        # separate projections (and never an XLA slice of the fused activation).
        fuse_ok = (ID % 128 == 0)

        if (q is k) and (k is v) and fuse_ok:
            # Fused QKV projection: self-attention reads the input from HBM once;
            # attention consumes lane blocks 0 / 1 / 2 of the fused activation.
            qkv = linear(q.reshape(B * Nq, C), self.qkv_w, self.qkv_b,
                         out_dtype=jnp.bfloat16).reshape(B, Nq, 3 * ID)
            oh = attention_core(qkv, qkv, qkv, ID, H, q_blk=0, k_blk=1, v_blk=2)
        else:
            qp = linear(q.reshape(B * Nq, C), self.q_w, self.q_b,
                        out_dtype=jnp.bfloat16).reshape(B, Nq, ID)
            if (k is v) and fuse_ok:
                # Fused KV projection; attention consumes lane blocks 0 / 1 directly.
                kvp = linear(k.reshape(B * Nk, C), self.kv_w, self.kv_b,
                             out_dtype=jnp.bfloat16).reshape(B, Nk, 2 * ID)
                oh = attention_core(qp, kvp, kvp, ID, H, k_blk=0, v_blk=1)
            else:
                kp = linear(k.reshape(B * Nk, C), self.k_w, self.k_b,
                            out_dtype=jnp.bfloat16).reshape(B, Nk, ID)
                vp = linear(v.reshape(B * Nk, C), self.v_w, self.v_b,
                            out_dtype=jnp.bfloat16).reshape(B, Nk, ID)
                oh = attention_core(qp, kp, vp, ID, H)

        # Output projection back to the input dtype.
        out = linear(oh.reshape(B * Nq, ID), self.o_w, self.o_b, out_dtype=out_dtype)
        return out.reshape(B, Nq, self.embedding_dim)


# ---------------------------------------------------------------------------
# Pure-JAX f32 reference (uses un-scaled f32 weight copies)
# ---------------------------------------------------------------------------
def reference_forward(mod, q, k, v):
    B, Nq, _ = q.shape
    Nk = k.shape[1]
    H = mod.num_heads
    d = mod.internal_dim // H
    p = mod._ref

    qp = q @ p["q_w"] + p["q_b"]
    kp = k @ p["k_w"] + p["k_b"]
    vp = v @ p["v_w"] + p["v_b"]

    qh = qp.reshape(B, Nq, H, d).transpose(0, 2, 1, 3)
    kh = kp.reshape(B, Nk, H, d).transpose(0, 2, 1, 3)
    vh = vp.reshape(B, Nk, H, d).transpose(0, 2, 1, 3)

    attn = jnp.einsum("bhqd,bhkd->bhqk", qh, kh) / math.sqrt(d)
    attn = jax.nn.softmax(attn, axis=-1)
    oh = jnp.einsum("bhqk,bhkd->bhqd", attn, vh)
    out = oh.transpose(0, 2, 1, 3).reshape(B, Nq, H * d)
    return out @ p["o_w"] + p["o_b"]


if __name__ == "__main__":
    root = jax.random.PRNGKey(0)
    kp1, kq, kk, kv, kp2, kx, kq2 = jax.random.split(root, 7)

    # --- small tests (internal_dim = 32: unaligned/fallback attention path) ---------
    mod = AttentionPallas(embedding_dim=32, num_heads=4, downsample_rate=1, key=kp1)
    q = jax.random.normal(kq, (2, 8, 32), jnp.float32)
    k = jax.random.normal(kk, (2, 16, 32), jnp.float32)
    v = jax.random.normal(kv, (2, 16, 32), jnp.float32)

    out = jax.block_until_ready(mod(q, k, v))                       # cross-attention
    ref = reference_forward(mod, q, k, v)
    assert out.shape == (2, 8, 32)
    assert jnp.allclose(out, ref, atol=5e-2, rtol=5e-2), "mismatch (cross-attention)"

    out2 = jax.block_until_ready(mod(q, k, k))                      # k is v (unaligned -> unfused)
    ref2 = reference_forward(mod, q, k, k)
    assert jnp.allclose(out2, ref2, atol=5e-2, rtol=5e-2), "mismatch (k is v)"

    # --- 128-aligned tests exercising fused QKV / KV projections, zero-copy lane-block
    #     BlockSpecs and the once-per-step K transpose -------------------------------
    mod2 = AttentionPallas(embedding_dim=128, num_heads=4, downsample_rate=1, key=kp2)
    x = jax.random.normal(kx, (1, 128, 128), jnp.float32)
    q2 = jax.random.normal(kq2, (1, 64, 128), jnp.float32)

    out3 = jax.block_until_ready(mod2(x, x, x))                     # fused QKV (q is k is v)
    ref3 = reference_forward(mod2, x, x, x)
    assert jnp.allclose(out3, ref3, atol=5e-2, rtol=5e-2), "mismatch (fused QKV)"

    out4 = jax.block_until_ready(mod2(q2, x, x))                    # fused KV (k is v)
    ref4 = reference_forward(mod2, q2, x, x)
    assert jnp.allclose(out4, ref4, atol=5e-2, rtol=5e-2), "mismatch (fused KV)"

    print("KERNEL_OK")
</pallas_src>

<mosaic_0001>
module attributes {stable_mosaic.version = 11 : i64} {
  func.func @_linear_kernel(%arg0: i32, %arg1: i32, %arg2: memref<16x32xf32, #tpu.memory_space<vmem>>, %arg3: memref<32x32xbf16, #tpu.memory_space<vmem>>, %arg4: memref<1x32xf32, #tpu.memory_space<vmem>>, %arg5: memref<16x32xbf16, #tpu.memory_space<vmem>>) attributes {dimension_semantics = [#tpu.dimension_semantics<parallel>, #tpu.dimension_semantics<parallel>], iteration_bounds = array<i64: 1, 1>, scalar_prefetch = 0 : i64, scratch_operands = 0 : i64, tpu.core_type = #tpu.core_type<tc>, window_params = [{transform_indices = @transform_0, window_bounds = array<i64: 16, 32>}, {transform_indices = @transform_1, window_bounds = array<i64: 32, 32>}, {transform_indices = @transform_2, window_bounds = array<i64: 1, 32>}, {transform_indices = @transform_3, window_bounds = array<i64: 16, 32>}]} {
    %c0 = arith.constant 0 : index
    %c0_0 = arith.constant 0 : index
    %0 = vector.load %arg2[%c0, %c0_0] : memref<16x32xf32, #tpu.memory_space<vmem>>, vector<16x32xf32>
    %1 = arith.truncf %0 : vector<16x32xf32> to vector<16x32xbf16>
    %c0_1 = arith.constant 0 : index
    %c0_2 = arith.constant 0 : index
    %2 = vector.load %arg3[%c0_1, %c0_2] : memref<32x32xbf16, #tpu.memory_space<vmem>>, vector<32x32xbf16>
    %cst = arith.constant dense<0.000000e+00> : vector<16x32xf32>
    %3 = tpu.matmul %1, %2, %cst {dimension_numbers = #tpu.dot_dimension_numbers<[1], [0], [0], [1], [0, 0, 1, 1], [], []>} : vector<16x32xbf16>, vector<32x32xbf16>, vector<16x32xf32> -> vector<16x32xf32>
    %c0_3 = arith.constant 0 : index
    %c0_4 = arith.constant 0 : index
    %4 = vector.load %arg4[%c0_3, %c0_4] : memref<1x32xf32, #tpu.memory_space<vmem>>, vector<1x32xf32>
    %5 = vector.broadcast %4 : vector<1x32xf32> to vector<16x32xf32>
    %6 = arith.addf %3, %5 : vector<16x32xf32>
    %7 = arith.truncf %6 : vector<16x32xf32> to vector<16x32xbf16>
    %c0_5 = arith.constant 0 : index
    %c0_6 = arith.constant 0 : index
    %8 = vector.load %arg5[%c0_5, %c0_6] : memref<16x32xbf16, #tpu.memory_space<vmem>>, vector<16x32xbf16>
    tpu.vector_store %arg5[%c0_5, %c0_6], %7 {strides = array<i32>} : memref<16x32xbf16, #tpu.memory_space<vmem>>, vector<16x32xbf16>,
    return
  }
  func.func @transform_0(%arg0: i32, %arg1: i32) -> (i32, i32) {
    %c0_i32 = arith.constant 0 : i32
    %c0_i32_0 = arith.constant 0 : i32
    return %arg0, %c0_i32 : i32, i32
  }
  func.func @transform_1(%arg0: i32, %arg1: i32) -> (i32, i32) {
    %c0_i32 = arith.constant 0 : i32
    %c0_i32_0 = arith.constant 0 : i32
    return %c0_i32, %arg1 : i32, i32
  }
  func.func @transform_2(%arg0: i32, %arg1: i32) -> (i32, i32) {
    %c0_i32 = arith.constant 0 : i32
    %c0_i32_0 = arith.constant 0 : i32
    return %c0_i32, %arg1 : i32, i32
  }
  func.func @transform_3(%arg0: i32, %arg1: i32) -> (i32, i32) {
    %c0_i32 = arith.constant 0 : i32
    return %arg0, %arg1 : i32, i32
  }
}

</mosaic_0001>

<bundles_post_ra>
// kernel: tpu_custom_call.1
= control target key start
LH: loop header
LB: loop body
LE: loop exit
PB: predicated region body
PF: predicated region fallthrough
CT: control target
= control target key end

     0   :  { %8 = vsyncpa [#allocation3], 0  ;;  %s320_s0 = inlined_call_operand.hbm [shape: f32[16,32], index: 0, kind: input, shape index: {}]   ;;  %s321_s1 = inlined_call_operand.hbm [shape: bf16[32,32], index: 1, kind: input, shape index: {}]   ;;  %s322_s2 = inlined_call_operand.vmem [shape: f32[1,32], index: 2, kind: input, shape index: {}]   ;;  %s323_s3 = inlined_call_operand.hbm [shape: bf16[16,32], index: 3, kind: output, shape index: {}]  }
   0x1   :  { %9 = vsyncpa [#allocation6], 0 }
   0x2   :  { %10 = vsyncpa [#allocation4], 0  ;;  %s246_s12 = smov [#allocation2]   ;;  %s174_s16 = scalar_lea.hbm %s320_s0, 256 }
   0x3   :  { %s16_s13 = sshll.u32 %s246_s12, 4  ;;  %p175_p0 = scmp.ne.s32.totalorder %s320_s0, %s174_s16  ;;  %s17_s13 = int_to_ptr.vmem [resolvable:$true] %s16_s13 }
   0x4   :  { %p178_p1 = scmp.lt.u32.totalorder %s174_s16, %s320_s0 }
   0x6   :  { %p180_p2 = pnand %p178_p1, %p175_p0 }
   0x8   :  { %183 = shalt.err (!%p180_p2)
}
   0x9   :  { %s184_s21 = scalar_lea.vmem %s17_s13, 256  ;;  %p189_p4 = scmp.lt.s32.totalorder %s17_s13, %s17_s13 }
   0xa   :  { %p185_p3 = scmp.ne.s32.totalorder %s17_s13, %s184_s21  ;;  %p190_p5 = scmp.lt.s32.totalorder %s184_s21, %s184_s21 }
   0xc   :  { %p191_p6 = por %p190_p5, %p189_p4 }
   0xe   :  { %p192_p7 = pnand %p191_p6, %p185_p3 }
  0x10   :  { %195 = shalt.err (!%p192_p7)
}
  0x11   :  { %s247_s22 = smov 128   ;;  %s248_s23 = smov 8  }
  0x12   :  { %22 = dma.hbm_to_vmem [thread:$0]  %s320_s0, 256, %s17_s13, [#allocation3], %s247_s22, %s247_s22, %s248_s23  }
  0x13   :  { %s249_s26 = smov [#allocation5]   ;;  %s196_s30 = scalar_lea.hbm %s321_s1, 256 }
  0x14   :  { %s28_s27 = sshll.u32 %s249_s26, 4  ;;  %p197_p8 = scmp.ne.s32.totalorder %s321_s1, %s196_s30  ;;  %s29_s27 = int_to_ptr.vmem [resolvable:$true] %s28_s27 }
  0x15   :  { %p200_p9 = scmp.lt.u32.totalorder %s196_s30, %s321_s1 }
  0x17   :  { %p202_p10 = pnand %p200_p9, %p197_p8 }
  0x19   :  { %205 = shalt.err (!%p202_p10)
}
  0x1a   :  { %s206_s8 = scalar_lea.vmem %s29_s27, 256  ;;  %p211_p12 = scmp.lt.s32.totalorder %s29_s27, %s29_s27 }
  0x1b   :  { %p207_p11 = scmp.ne.s32.totalorder %s29_s27, %s206_s8  ;;  %p212_p13 = scmp.lt.s32.totalorder %s206_s8, %s206_s8 }
  0x1d   :  { %p213_p0 = por %p212_p13, %p211_p12 }
  0x1f   :  { %p214_p1 = pnand %p213_p0, %p207_p11 }
  0x21   :  { %217 = shalt.err (!%p214_p1)
}
  0x22   :  { %s250_s0 = smov 64   ;;  %s251_s9 = smov 4  }
  0x23   :  { %34 = dma.hbm_to_vmem [thread:$0]  %s321_s1, 256, %s29_s27, [#allocation6], %s250_s0, %s250_s0, %s251_s9  }
  0x24   :  { %240 = dma.done.wait [#allocation3], 256  }
  0x25   :  { %241 = vsyncadd [#allocation3], 4294967040 }
  0x26   :  { %242 = dma.done.wait [#allocation6], 256  }
  0x27   :  { %243 = vsyncadd [#allocation6], 4294967040  ;;  %v252_v0 = vmov 0.0   ;;  %vm253_vm0 = vmmov 0   ;;  %v172_v1 = vld [vmem:[#allocation5] sm:$0xff]   ;;  %v173_v2 = vld [vmem:[#allocation5 + $0x8] sm:$0xff]  }
  0x28   :  { %155 = vmatprep.subr.bf16.mxu0 %v252_v0  ;;  %159 = vmatprep.mubr.msk.bf16.mxu0 %vm253_vm0, %v252_v0  ;;  %v44_v3 = vld [vmem:[#allocation2] sm:$0xff]  ;;  %v45_v4 = vld [vmem:[#allocation2 + $0x8] sm:$0xff]  ;;  %vm70_vm1 = vcmask 261120   ;;  %vm123_vm2 = vcmask 257024   ;;  %s254_s13 = smov [#allocation7]  }
  0x29   :  { %156 = vmatpush3.bf16.msra.mxu0 %v172_v1  ;;  %v46_v5 = vpack.c.bf16 %v45_v4, %v44_v3  ;;  %v144_v6 = vld [vmem:[%s322_s2] ss:$0 sm:$0xff]  ;;  %s131_s14 = sshll.u32 %s254_s13, 4  ;;  %s132_s14 = int_to_ptr.vmem [resolvable:$true] %s131_s14 }
  0x2a   :  { %157 = vmatprep.subr.bf16.mxu0 %v252_v0  ;;  %s218_s15 = scalar_lea.vmem %s132_s14, 128  ;;  %p223_p3 = scmp.lt.s32.totalorder %s132_s14, %s132_s14 }
  0x2b   :  { %p219_p2 = scmp.ne.s32.totalorder %s132_s14, %s218_s15  ;;  %p224_p4 = scmp.lt.s32.totalorder %s218_s15, %s218_s15 }
  0x2d   :  { %158 = vmatpush3.bf16.msra.mxu0 %v173_v2  ;;  %p225_p5 = por %p224_p4, %p223_p3 }
  0x2f   :  { %p226_p6 = pnand %p225_p5, %p219_p2 }
  0x30   :  { %160 = vmatmul.mubr.msk.bf16.vlgmr.msra.gmra.mrb[0].mxu0 %vm70_vm1, %v46_v5 }
 0x103   :  { %v108_v7 = vpop.f32.mrb[0].mxu0 }
 0x104   :  { %v109_v8 = vadd.f32 %v144_v6, %v108_v7  ;;  %v161_v9 = vpop.f32.mrb[1].mxu0 }
 0x105   :  { %v111_v10 = vpop.f32.mrb[2].mxu0 }
 0x106   :  { %v150_v11 = vpack.c.bf16 %v109_v8, %v109_v8  ;;  %v112_v12 = vadd.f32 %v144_v6, %v111_v10  ;;  %v162_v13 = vpop.f32.mrb[3].mxu0 }
 0x108   :  { %v151_v14 = vpack.c.bf16 %v112_v12, %v112_v12  ;;  %124 = vst.msk [vmem:[#allocation7] sm:$0xf] %vm123_vm2, %v150_v11 }
 0x10a   :  { %125 = vst.msk [vmem:[#allocation7 + $0x4] sm:$0xf] %vm123_vm2, %v151_v14 }
 0x10b   :  { %229 = shalt.err (!%p226_p6)
}
 0x10c   :  { %s230_s17 = scalar_lea.hbm %s323_s3, 128 }
 0x10d   :  { %p231_p7 = scmp.ne.s32.totalorder %s323_s3, %s230_s17  ;;  %p234_p8 = scmp.lt.u32.totalorder %s230_s17, %s323_s3 }
 0x10f   :  { %p236_p9 = pnand %p234_p8, %p231_p7 }
 0x111   :  { %239 = shalt.err (!%p236_p9)
}
 0x112   :  { %137 = dma.vmem_to_hbm [thread:$0]  %s132_s14, 128, %s323_s3, [#allocation4], %s250_s0, %s250_s0, %s251_s9  }
 0x113   :  { %244 = dma.done.wait [#allocation4], 128  }
 0x114   :  { %245 = vsyncadd [#allocation4], 4294967168 }
 0x115   :  { %141 = vsyncpa [#allocation3], 1 }
 0x116   :  { %142 = vsyncpa [#allocation6], 1 }
 0x117   :  { %143 = vsyncpa [#allocation4], 1 }

</bundles_post_ra>
